<compile_context>
chip_gen: v5e
topology: v5e:2x2
jax: 0.10.0
libtpu: 0.0.40
codegen_flags: <defaults>
</compile_context>

<pallas_src>
import math
from functools import partial

import jax
import jax.numpy as jnp
from jax import lax
from jax.experimental import pallas as pl
from jax.experimental.pallas import tpu as pltpu


def _round_up(a, m):
    return -(-a // m) * m


def _softplus(x):
    # numerically stable softplus(x) = max(x, 0) + log1p(exp(-|x|))
    return jnp.maximum(x, 0.0) + jnp.log1p(jnp.exp(-jnp.abs(x)))


def _log_g(h):
    # log(g(h)) with 2 transcendentals (exp + log1p) instead of 3:
    #   h >= 0 : log(h + 0.5)    = log1p(h - 0.5)
    #   h <  0 : log(sigmoid(h)) = h - log1p(exp(h))
    eh = jnp.exp(jnp.minimum(h, 0.0))
    lp = jnp.log1p(jnp.where(h >= 0.0, h - 0.5, eh))
    return jnp.where(h >= 0.0, lp, h - lp)


def minlstm_kernel(x_ref, wg_ref, wo_ref, b_ref, o_ref, m_sc, r_sc, *,
                   S, SC, H_band, num_chunks, compute_dtype, needs_mask):
    """One (batch-tile, seq-chunk) grid step.

    x_ref : (TB, SC, D_pad)    mxu dtype       (auto-pipelined block)
    wg_ref: (D_pad, 3*H_band)  mxu dtype       (whole array, VMEM resident)
    wo_ref: (H_band, O_pad)    f32             (whole array, VMEM resident)
    b_ref : (1, O_pad)         f32             (whole array, VMEM resident)
    o_ref : (TB, O_pad)        f32             (written on the last seq chunk)
    m_sc  : (TB, H_band)       compute dtype   running max of the logsumexp
    r_sc  : (TB, H_band)       f32             running (rescaled) sum
    """
    s = pl.program_id(1)
    TB, _, D = x_ref.shape
    cw = compute_dtype

    @pl.when(s == 0)
    def _():
        # v_0 = log g(h_prev = 0) = log(0.5); seed the online logsumexp there.
        m_sc[...] = jnp.full(m_sc.shape, math.log(0.5), m_sc.dtype)
        r_sc[...] = jnp.ones(r_sc.shape, r_sc.dtype)

    # ---- hot path 1: ONE fused, lane-banded gate projection (f32 accumulate)
    x = x_ref[...].reshape(TB * SC, D)       # layout-preserving (SC % tile == 0)
    z = jnp.dot(x, wg_ref[...], preferred_element_type=jnp.float32)

    # 128-lane-aligned slices of the f32 result (free), then compute dtype.
    f = z[:, 0 * H_band:1 * H_band].astype(cw)
    i = z[:, 1 * H_band:2 * H_band].astype(cw)
    h = z[:, 2 * H_band:3 * H_band].astype(cw)

    # ---- hot path 2: log-space gating (EUP-bound) in the compute dtype ------
    # softplus identity: log_i - log_f == diff, so v = diff + log_g(h); the
    # full-size log_i / log_f slabs are never materialized.
    diff = _softplus(-f) - _softplus(-i)                     # (TB*SC, H_band)
    v = (diff + _log_g(h)).reshape(TB, SC, H_band)

    if needs_mask:     # static: only when S was padded up to a chunk multiple
        t = s * SC + lax.broadcasted_iota(jnp.int32, (TB, SC, H_band), 1)
        v = jnp.where(t < S, v, -1e30)

    # ---- hot path 3: online logsumexp over the sequence axis ----------------
    # Running max kept in the compute dtype so the shift fed to exp() is exactly
    # the value added back at the end; the running sum stays f32.
    m_prev = m_sc[...]
    m_new = jnp.maximum(m_prev, jnp.max(v, axis=1))
    p = jnp.exp(v - m_new[:, None, :])                        # (TB, SC, H_band)
    r_sc[...] = (r_sc[...]
                 * jnp.exp(m_prev.astype(jnp.float32) - m_new.astype(jnp.float32))
                 + jnp.sum(p.astype(jnp.float32), axis=1))
    m_sc[...] = m_new

    # ---- finalize on the last chunk (always contains the last real timestep)
    @pl.when(s == num_chunks - 1)
    def _():
        li = (S - 1) - (num_chunks - 1) * SC                  # static local index
        diff_last = diff.reshape(TB, SC, H_band)[:, li, :].astype(jnp.float32)
        log_f_last = -_softplus(diff_last)                    # a_star[:, -1, :]
        lse = m_sc[...].astype(jnp.float32) + jnp.log(r_sc[...])
        h_last = jnp.exp(log_f_last + lse)                    # (TB, H_band) f32
        out = jnp.dot(h_last, wo_ref[...],
                      preferred_element_type=jnp.float32) + b_ref[...]
        o_ref[...] = out.astype(o_ref.dtype)


def _auto_compute_dtype():
    """bf16 gating on chips with a bf16 VPU/EUP (v6e, v7x); f32 otherwise."""
    try:
        kind = jax.devices()[0].device_kind.lower()
    except Exception:
        return jnp.float32
    if any(tag in kind for tag in ("v2", "v3", "v4", "v5")):
        return jnp.float32
    return jnp.bfloat16


def _vmem_capacity_bytes():
    try:
        return int(pltpu.get_tpu_info().vmem_capacity_bytes)
    except Exception:
        return 64 << 20           # conservative fallback: v7x per-TensorCore VMEM


def _choose_tiles(B, S, D_pad, H_band, O_pad, mxu_bytes, cw_bytes, vmem_cap,
                  sc_align, batch_tile=None, seq_chunk=None):
    """Largest (batch tile, seq chunk) whose live set fits a generation-aware
    VMEM budget (resident weights counted; x / out double-buffered)."""
    budget = int(vmem_cap * 0.6)
    weights = D_pad * 3 * H_band * mxu_bytes + (H_band + 1) * O_pad * 4
    avail = max(budget - weights, 2 << 20)

    # per (batch element, chunk timestep): x row (dbl-buffered) + fused f32 gate
    # slab + ~5 compute-dtype gating intermediates
    per_row = 2 * D_pad * mxu_bytes + 3 * H_band * 4 + 5 * H_band * cw_bytes
    # per batch element, chunk-independent: out block (dbl-buffered) + 2 accums
    per_b = 2 * O_pad * 4 + 2 * H_band * 4

    def max_tb(sc):
        return avail // (sc * per_row + per_b)

    if seq_chunk is not None:
        SC = _round_up(seq_chunk, sc_align)
    else:
        n_chunks = max(1, -(-S // 256))                    # target ~256-row chunks
        SC = _round_up(-(-S // n_chunks), sc_align)
        while SC > sc_align and max_tb(SC) < 1:
            SC = _round_up(max(sc_align, SC // 2), sc_align)

    if batch_tile is not None:
        TB = B if batch_tile >= B else min(B, _round_up(batch_tile, 8))
    else:
        TB = int(max(1, max_tb(SC)))
        if TB >= B:
            TB = B
            if B >= 16:
                # always >= 2 batch tiles so dual-TC chips (v7x) use both cores
                TB = _round_up(-(-B // 2), 8)
        else:
            TB = min(B, max(8, (TB // 8) * 8))   # out-block sublane alignment
    return TB, SC


def minlstm_forward(x, w1_t, wout_t, bias, *, mxu_dtype=jnp.bfloat16,
                    compute_dtype=None, batch_tile=None, seq_chunk=None):
    """MinLSTM forward.  x: (B, S, D) f32; w1_t: (D, 3H) = linear.weight.T;
    wout_t: (H, O) = output_layer.weight.T; bias: (O,).

    mxu_dtype    : dtype of the gate-projection MXU operands (bf16 is MXU-native
                   on every TPU generation and halves x DMA bytes; None -> f32).
    compute_dtype: dtype of the elementwise/transcendental gating math
                   (None -> bf16 on chips with a bf16 VPU/EUP (v6e/v7x), else
                   f32).  The logsumexp running sum, final exp and output
                   projection always stay f32.
    """
    B, S, D = x.shape
    H = w1_t.shape[1] // 3
    O = wout_t.shape[1]

    mxu = jnp.dtype(mxu_dtype) if mxu_dtype is not None else jnp.dtype(jnp.float32)
    cw = (jnp.dtype(compute_dtype) if compute_dtype is not None
          else jnp.dtype(_auto_compute_dtype()))

    D_pad = _round_up(D, 128)     # lane-align the MXU K dim (zero pad, exact)
    H_band = _round_up(H, 128)    # per-gate 128-lane-aligned band
    O_pad = _round_up(O, 128)     # lane-dense (unmasked) output stores

    # Fused gate weight (D_pad, 3*H_band): gates in 128-aligned bands, zero pad
    # (exact: padded H columns are killed by zero rows of the padded W_out).
    def band(w):
        return jnp.pad(w, ((0, D_pad - D), (0, H_band - H)))
    wg = jnp.concatenate([band(w1_t[:, 0 * H:1 * H]),
                          band(w1_t[:, 1 * H:2 * H]),
                          band(w1_t[:, 2 * H:3 * H])], axis=1).astype(mxu)

    wo_p = jnp.pad(wout_t.astype(jnp.float32), ((0, H_band - H), (0, O_pad - O)))
    b_p = jnp.pad(bias.astype(jnp.float32).reshape(1, O), ((0, 0), (0, O_pad - O)))

    # keep the (TB, SC, D)->(TB*SC, D) kernel reshape layout-preserving for the
    # narrowest dtype involved (sublane tile: 8 for 4-byte, 16 for 2-byte)
    sc_align = max(8, 32 // min(mxu.itemsize, cw.itemsize))

    vmem_cap = _vmem_capacity_bytes()
    TB, SC = _choose_tiles(B, S, D_pad, H_band, O_pad, mxu.itemsize, cw.itemsize,
                           vmem_cap, sc_align,
                           batch_tile=batch_tile, seq_chunk=seq_chunk)
    num_chunks = -(-S // SC)
    S_pad = num_chunks * SC

    x_p = x
    if D_pad != D or S_pad != S:
        x_p = jnp.pad(x_p, ((0, 0), (0, S_pad - S), (0, D_pad - D)))
    x_p = x_p.astype(mxu)

    grid = (pl.cdiv(B, TB), num_chunks)
    kernel = partial(minlstm_kernel, S=S, SC=SC, H_band=H_band,
                     num_chunks=num_chunks, compute_dtype=cw,
                     needs_mask=(S_pad != S))

    out = pl.pallas_call(
        kernel,
        out_shape=jax.ShapeDtypeStruct((B, O_pad), jnp.float32),
        grid=grid,
        in_specs=[
            # activations: one (batch-tile, seq-chunk) block per grid step,
            # auto double-buffered HBM->VMEM.  A ragged last batch tile reads
            # clamped rows whose results are discarded by the masked stores.
            pl.BlockSpec((TB, SC, D_pad), lambda b, s: (b, s, 0)),
            # weights / bias: whole-array VMEM residents -> single copy, no
            # per-step DMA, no 2x pipeline buffering.
            pl.BlockSpec(memory_space=pltpu.MemorySpace.VMEM),
            pl.BlockSpec(memory_space=pltpu.MemorySpace.VMEM),
            pl.BlockSpec(memory_space=pltpu.MemorySpace.VMEM),
        ],
        out_specs=pl.BlockSpec((TB, O_pad), lambda b, s: (b, 0)),
        scratch_shapes=[
            pltpu.VMEM((TB, H_band), cw),            # running max
            pltpu.VMEM((TB, H_band), jnp.float32),   # running (rescaled) sum
        ],
        compiler_params=pltpu.CompilerParams(
            # batch tiles are independent -> shardable across v7x's 2 TCs;
            # seq chunks carry the logsumexp accumulator -> arbitrary.
            # TODO(synk): evaluate pltpu.CORE_PARALLEL for the batch axis on v7x.
            dimension_semantics=("parallel", "arbitrary"),
            vmem_limit_bytes=int(max(32 << 20, min(0.85 * vmem_cap, 110 << 20))),
        ),
    )(x_p, wg, wo_p, b_p)

    return out[:, :O] if O_pad != O else out


def minlstm_reference(x, w1_t, wout_t, bias):
    """Pure-JAX transcription of the PyTorch forward (for validation)."""
    B, S, D = x.shape
    H = w1_t.shape[1] // 3
    z = x @ w1_t                                                   # (B, S, 3H)
    f, i, h = jnp.split(z, 3, axis=-1)
    sp = lambda t: jnp.logaddexp(t, 0.0)
    log_g = lambda t: jnp.where(t >= 0, jnp.log(jnp.maximum(t, 0.0) + 0.5), -sp(-t))
    diff = sp(-f) - sp(-i)
    log_f = -sp(diff)
    log_i = -sp(-diff)
    log_h0 = jnp.full((B, 1, H), math.log(0.5), jnp.float32)
    a_star = jnp.concatenate([jnp.zeros((B, 1, H), jnp.float32), log_f], axis=1)
    log_values = jnp.concatenate([log_h0, log_i + log_g(h)], axis=1)
    v = log_values - a_star
    lse_last = jax.nn.logsumexp(v, axis=1)                         # last cum value
    h_last = jnp.exp(a_star[:, -1, :] + lse_last)
    return h_last @ wout_t + bias[None, :]


if __name__ == "__main__":
    B, S, D, H, O = 2, 8, 16, 32, 8

    key = jax.random.PRNGKey(0)
    kx, k1, k2, k3 = jax.random.split(key, 4)

    x = jax.random.normal(kx, (B, S, D), jnp.float32)
    bnd1 = 1.0 / math.sqrt(D)
    w1_t = jax.random.uniform(k1, (D, 3 * H), jnp.float32, -bnd1, bnd1)   # linear.weight.T
    bnd2 = 1.0 / math.sqrt(H)
    wout_t = jax.random.uniform(k2, (H, O), jnp.float32, -bnd2, bnd2)     # output_layer.weight.T
    bias = jax.random.uniform(k3, (O,), jnp.float32, -bnd2, bnd2)

    ref = jax.block_until_ready(minlstm_reference(x, w1_t, wout_t, bias))

    # exact-algebra configuration: f32 MXU operands + f32 gating, tight tolerance
    out_f32 = jax.block_until_ready(
        minlstm_forward(x, w1_t, wout_t, bias,
                        mxu_dtype=None, compute_dtype=jnp.float32))
    assert out_f32.shape == (B, O)
    assert jnp.allclose(out_f32, ref, atol=1e-3, rtol=1e-3), (out_f32, ref)

    # performance configuration (v6e/v7x): bf16 MXU operands + bf16 gating
    # transcendentals (logsumexp accumulation stays f32); relaxed tolerance.
    out_bf16 = jax.block_until_ready(
        minlstm_forward(x, w1_t, wout_t, bias,
                        mxu_dtype=jnp.bfloat16, compute_dtype=jnp.bfloat16))
    assert out_bf16.shape == (B, O)
    assert jnp.allclose(out_bf16, ref, atol=1e-1, rtol=1e-1), (out_bf16, ref)

    print("KERNEL_OK")
</pallas_src>

<mosaic_0001>
module attributes {stable_mosaic.version = 11 : i64} {
  func.func @minlstm_kernel(%arg0: i32, %arg1: i32, %arg2: memref<2x8x128xf32, #tpu.memory_space<vmem>>, %arg3: memref<128x384xf32, #tpu.memory_space<vmem>>, %arg4: memref<128x128xf32, #tpu.memory_space<vmem>>, %arg5: memref<1x128xf32, #tpu.memory_space<vmem>>, %arg6: memref<2x128xf32, #tpu.memory_space<vmem>>, %arg7: memref<2x128xf32, #tpu.memory_space<vmem>>, %arg8: memref<2x128xf32, #tpu.memory_space<vmem>>) attributes {dimension_semantics = [#tpu.dimension_semantics<parallel>, #tpu.dimension_semantics<arbitrary>], iteration_bounds = array<i64: 1, 1>, scalar_prefetch = 0 : i64, scratch_operands = 2 : i64, tpu.core_type = #tpu.core_type<tc>, window_params = [{transform_indices = @transform_0, window_bounds = array<i64: 2, 8, 128>}, {pipeline_mode = #tpu.pipeline_mode<synchronous>, transform_indices = @transform_1, window_bounds = array<i64: 128, 384>}, {pipeline_mode = #tpu.pipeline_mode<synchronous>, transform_indices = @transform_2, window_bounds = array<i64: 128, 128>}, {pipeline_mode = #tpu.pipeline_mode<synchronous>, transform_indices = @transform_3, window_bounds = array<i64: 1, 128>}, {transform_indices = @transform_4, window_bounds = array<i64: 2, 128>}]} {
    %c0_i32 = arith.constant 0 : i32
    %0 = arith.cmpi eq, %arg1, %c0_i32 : i32
    %1 = arith.extui %0 : i1 to i32
    %c0_i32_0 = arith.constant 0 : i32
    %2 = arith.cmpi ne, %1, %c0_i32_0 : i32
    scf.if %2 {
      %cst_27 = arith.constant -0.693147182 : f32
      %64 = vector.broadcast %cst_27 : f32 to vector<2x128xf32>
      %c0_28 = arith.constant 0 : index
      %c0_29 = arith.constant 0 : index
      %65 = vector.load %arg7[%c0_28, %c0_29] : memref<2x128xf32, #tpu.memory_space<vmem>>, vector<2x128xf32>
      tpu.vector_store %arg7[%c0_28, %c0_29], %64 {strides = array<i32>} : memref<2x128xf32, #tpu.memory_space<vmem>>, vector<2x128xf32>,
      %cst_30 = arith.constant 1.000000e+00 : f32
      %66 = vector.broadcast %cst_30 : f32 to vector<2x128xf32>
      %c0_31 = arith.constant 0 : index
      %c0_32 = arith.constant 0 : index
      %67 = vector.load %arg8[%c0_31, %c0_32] : memref<2x128xf32, #tpu.memory_space<vmem>>, vector<2x128xf32>
      tpu.vector_store %arg8[%c0_31, %c0_32], %66 {strides = array<i32>} : memref<2x128xf32, #tpu.memory_space<vmem>>, vector<2x128xf32>,
    } else {
    }
    %c0 = arith.constant 0 : index
    %c0_1 = arith.constant 0 : index
    %c0_2 = arith.constant 0 : index
    %3 = vector.load %arg2[%c0, %c0_1, %c0_2] : memref<2x8x128xf32, #tpu.memory_space<vmem>>, vector<2x8x128xf32>
    %4 = vector.shape_cast %3 : vector<2x8x128xf32> to vector<16x128xf32>
    %c0_3 = arith.constant 0 : index
    %c0_4 = arith.constant 0 : index
    %5 = vector.load %arg3[%c0_3, %c0_4] : memref<128x384xf32, #tpu.memory_space<vmem>>, vector<128x384xf32>
    %cst = arith.constant dense<0.000000e+00> : vector<16x384xf32>
    %6 = tpu.matmul %4, %5, %cst {dimension_numbers = #tpu.dot_dimension_numbers<[1], [0], [0], [1], [0, 0, 1, 1], [], []>} : vector<16x128xf32>, vector<128x384xf32>, vector<16x384xf32> -> vector<16x384xf32>
    %7 = vector.extract_strided_slice %6 {offsets = [0, 0], sizes = [16, 128], strides = [1, 1]} : vector<16x384xf32> to vector<16x128xf32>
    %8 = vector.extract_strided_slice %6 {offsets = [0, 128], sizes = [16, 128], strides = [1, 1]} : vector<16x384xf32> to vector<16x128xf32>
    %9 = vector.extract_strided_slice %6 {offsets = [0, 256], sizes = [16, 128], strides = [1, 1]} : vector<16x384xf32> to vector<16x128xf32>
    %cst_5 = arith.constant 0.000000e+00 : f32
    %10 = vector.broadcast %cst_5 : f32 to vector<16x128xf32>
    %11 = arith.subf %10, %7 : vector<16x128xf32>
    %cst_6 = arith.constant 0.000000e+00 : f32
    %12 = vector.broadcast %cst_6 : f32 to vector<16x128xf32>
    %13 = arith.maximumf %11, %12 : vector<16x128xf32>
    %14 = math.absf %11 : vector<16x128xf32>
    %cst_7 = arith.constant 0.000000e+00 : f32
    %15 = vector.broadcast %cst_7 : f32 to vector<16x128xf32>
    %16 = arith.subf %15, %14 : vector<16x128xf32>
    %17 = math.exp %16 : vector<16x128xf32>
    %18 = math.log1p %17 : vector<16x128xf32>
    %19 = arith.addf %13, %18 : vector<16x128xf32>
    %cst_8 = arith.constant 0.000000e+00 : f32
    %20 = vector.broadcast %cst_8 : f32 to vector<16x128xf32>
    %21 = arith.subf %20, %8 : vector<16x128xf32>
    %cst_9 = arith.constant 0.000000e+00 : f32
    %22 = vector.broadcast %cst_9 : f32 to vector<16x128xf32>
    %23 = arith.maximumf %21, %22 : vector<16x128xf32>
    %24 = math.absf %21 : vector<16x128xf32>
    %cst_10 = arith.constant 0.000000e+00 : f32
    %25 = vector.broadcast %cst_10 : f32 to vector<16x128xf32>
    %26 = arith.subf %25, %24 : vector<16x128xf32>
    %27 = math.exp %26 : vector<16x128xf32>
    %28 = math.log1p %27 : vector<16x128xf32>
    %29 = arith.addf %23, %28 : vector<16x128xf32>
    %30 = arith.subf %19, %29 : vector<16x128xf32>
    %cst_11 = arith.constant 0.000000e+00 : f32
    %31 = vector.broadcast %cst_11 : f32 to vector<16x128xf32>
    %32 = arith.minimumf %9, %31 : vector<16x128xf32>
    %33 = math.exp %32 : vector<16x128xf32>
    %cst_12 = arith.constant 0.000000e+00 : f32
    %34 = vector.broadcast %cst_12 : f32 to vector<16x128xf32>
    %35 = arith.cmpf oge, %9, %34 : vector<16x128xf32>
    %cst_13 = arith.constant 5.000000e-01 : f32
    %36 = vector.broadcast %cst_13 : f32 to vector<16x128xf32>
    %37 = arith.subf %9, %36 : vector<16x128xf32>
    %38 = arith.select %35, %37, %33 : vector<16x128xi1>, vector<16x128xf32>
    %39 = math.log1p %38 : vector<16x128xf32>
    %cst_14 = arith.constant 0.000000e+00 : f32
    %40 = vector.broadcast %cst_14 : f32 to vector<16x128xf32>
    %41 = arith.cmpf oge, %9, %40 : vector<16x128xf32>
    %42 = arith.subf %9, %39 : vector<16x128xf32>
    %43 = arith.select %41, %39, %42 : vector<16x128xi1>, vector<16x128xf32>
    %44 = arith.addf %30, %43 : vector<16x128xf32>
    %45 = vector.shape_cast %44 : vector<16x128xf32> to vector<2x8x128xf32>
    %c0_15 = arith.constant 0 : index
    %c0_16 = arith.constant 0 : index
    %46 = vector.load %arg7[%c0_15, %c0_16] : memref<2x128xf32, #tpu.memory_space<vmem>>, vector<2x128xf32>
    %cst_17 = arith.constant dense<0xFF800000> : vector<2x128xf32>
    %47 = vector.multi_reduction <maximumf>, %45, %cst_17 [1] : vector<2x8x128xf32> to vector<2x128xf32>
    %48 = arith.maximumf %46, %47 : vector<2x128xf32>
    %49 = vector.shape_cast %48 : vector<2x128xf32> to vector<2x1x128xf32>
    %50 = vector.broadcast %49 : vector<2x1x128xf32> to vector<2x8x128xf32>
    %51 = arith.subf %45, %50 : vector<2x8x128xf32>
    %52 = math.exp %51 : vector<2x8x128xf32>
    %c0_18 = arith.constant 0 : index
    %c0_19 = arith.constant 0 : index
    %53 = vector.load %arg8[%c0_18, %c0_19] : memref<2x128xf32, #tpu.memory_space<vmem>>, vector<2x128xf32>
    %54 = arith.subf %46, %48 : vector<2x128xf32>
    %55 = math.exp %54 : vector<2x128xf32>
    %56 = arith.mulf %53, %55 : vector<2x128xf32>
    %cst_20 = arith.constant dense<0.000000e+00> : vector<2x128xf32>
    %57 = vector.multi_reduction <add>, %52, %cst_20 [1] : vector<2x8x128xf32> to vector<2x128xf32>
    %58 = arith.addf %56, %57 : vector<2x128xf32>
    %c0_21 = arith.constant 0 : index
    %c0_22 = arith.constant 0 : index
    %59 = vector.load %arg8[%c0_21, %c0_22] : memref<2x128xf32, #tpu.memory_space<vmem>>, vector<2x128xf32>
    tpu.vector_store %arg8[%c0_21, %c0_22], %58 {strides = array<i32>} : memref<2x128xf32, #tpu.memory_space<vmem>>, vector<2x128xf32>,
    %c0_23 = arith.constant 0 : index
    %c0_24 = arith.constant 0 : index
    %60 = vector.load %arg7[%c0_23, %c0_24] : memref<2x128xf32, #tpu.memory_space<vmem>>, vector<2x128xf32>
    tpu.vector_store %arg7[%c0_23, %c0_24], %48 {strides = array<i32>} : memref<2x128xf32, #tpu.memory_space<vmem>>, vector<2x128xf32>,
    %c0_i32_25 = arith.constant 0 : i32
    %61 = arith.cmpi eq, %arg1, %c0_i32_25 : i32
    %62 = arith.extui %61 : i1 to i32
    %c0_i32_26 = arith.constant 0 : i32
    %63 = arith.cmpi ne, %62, %c0_i32_26 : i32
    scf.if %63 {
      %64 = vector.shape_cast %30 : vector<16x128xf32> to vector<2x8x128xf32>
      %65 = vector.extract_strided_slice %64 {offsets = [0, 7, 0], sizes = [2, 1, 128], strides = [1, 1, 1]} : vector<2x8x128xf32> to vector<2x1x128xf32>
      %66 = vector.shape_cast %65 : vector<2x1x128xf32> to vector<2x128xf32>
      %cst_27 = arith.constant 0.000000e+00 : f32
      %67 = vector.broadcast %cst_27 : f32 to vector<2x128xf32>
      %68 = arith.maximumf %66, %67 : vector<2x128xf32>
      %69 = math.absf %66 : vector<2x128xf32>
      %cst_28 = arith.constant 0.000000e+00 : f32
      %70 = vector.broadcast %cst_28 : f32 to vector<2x128xf32>
      %71 = arith.subf %70, %69 : vector<2x128xf32>
      %72 = math.exp %71 : vector<2x128xf32>
      %73 = math.log1p %72 : vector<2x128xf32>
      %74 = arith.addf %68, %73 : vector<2x128xf32>
      %cst_29 = arith.constant 0.000000e+00 : f32
      %75 = vector.broadcast %cst_29 : f32 to vector<2x128xf32>
      %76 = arith.subf %75, %74 : vector<2x128xf32>
      %c0_30 = arith.constant 0 : index
      %c0_31 = arith.constant 0 : index
      %77 = vector.load %arg7[%c0_30, %c0_31] : memref<2x128xf32, #tpu.memory_space<vmem>>, vector<2x128xf32>
      %c0_32 = arith.constant 0 : index
      %c0_33 = arith.constant 0 : index
      %78 = vector.load %arg8[%c0_32, %c0_33] : memref<2x128xf32, #tpu.memory_space<vmem>>, vector<2x128xf32>
      %79 = math.log %78 : vector<2x128xf32>
      %80 = arith.addf %77, %79 : vector<2x128xf32>
      %81 = arith.addf %76, %80 : vector<2x128xf32>
      %82 = math.exp %81 : vector<2x128xf32>
      %c0_34 = arith.constant 0 : index
      %c0_35 = arith.constant 0 : index
      %83 = vector.load %arg4[%c0_34, %c0_35] : memref<128x128xf32, #tpu.memory_space<vmem>>, vector<128x128xf32>
      %cst_36 = arith.constant dense<0.000000e+00> : vector<2x128xf32>
      %84 = tpu.matmul %82, %83, %cst_36 {dimension_numbers = #tpu.dot_dimension_numbers<[1], [0], [0], [1], [0, 0, 1, 1], [], []>} : vector<2x128xf32>, vector<128x128xf32>, vector<2x128xf32> -> vector<2x128xf32>
      %c0_37 = arith.constant 0 : index
      %c0_38 = arith.constant 0 : index
      %85 = vector.load %arg5[%c0_37, %c0_38] : memref<1x128xf32, #tpu.memory_space<vmem>>, vector<1x128xf32>
      %86 = vector.broadcast %85 : vector<1x128xf32> to vector<2x128xf32>
      %87 = arith.addf %84, %86 : vector<2x128xf32>
      %c0_39 = arith.constant 0 : index
      %c0_40 = arith.constant 0 : index
      %88 = vector.load %arg6[%c0_39, %c0_40] : memref<2x128xf32, #tpu.memory_space<vmem>>, vector<2x128xf32>
      tpu.vector_store %arg6[%c0_39, %c0_40], %87 {strides = array<i32>} : memref<2x128xf32, #tpu.memory_space<vmem>>, vector<2x128xf32>,
    } else {
    }
    return
  }
  func.func @transform_0(%arg0: i32, %arg1: i32) -> (i32, i32, i32) {
    %c0_i32 = arith.constant 0 : i32
    %c0_i32_0 = arith.constant 0 : i32
    return %arg0, %arg1, %c0_i32 : i32, i32, i32
  }
  func.func @transform_1(%arg0: i32, %arg1: i32) -> (i32, i32) {
    %c0_i32 = arith.constant 0 : i32
    %c0_i32_0 = arith.constant 0 : i32
    %c0_i32_1 = arith.constant 0 : i32
    return %c0_i32, %c0_i32_0 : i32, i32
  }
  func.func @transform_2(%arg0: i32, %arg1: i32) -> (i32, i32) {
    %c0_i32 = arith.constant 0 : i32
    %c0_i32_0 = arith.constant 0 : i32
    %c0_i32_1 = arith.constant 0 : i32
    return %c0_i32, %c0_i32_0 : i32, i32
  }
  func.func @transform_3(%arg0: i32, %arg1: i32) -> (i32, i32) {
    %c0_i32 = arith.constant 0 : i32
    %c0_i32_0 = arith.constant 0 : i32
    %c0_i32_1 = arith.constant 0 : i32
    return %c0_i32, %c0_i32_0 : i32, i32
  }
  func.func @transform_4(%arg0: i32, %arg1: i32) -> (i32, i32) {
    %c0_i32 = arith.constant 0 : i32
    %c0_i32_0 = arith.constant 0 : i32
    return %arg0, %c0_i32 : i32, i32
  }
}

</mosaic_0001>

<bundles_post_ra>
// kernel: tpu_custom_call.1
= control target key start
LH: loop header
LB: loop body
LE: loop exit
PB: predicated region body
PF: predicated region fallthrough
CT: control target
= control target key end

     0   :  { %9 = vsyncpa [#allocation5], 0  ;;  %s750_s0 = inlined_call_operand.hbm [shape: f32[2,8,128], index: 0, kind: input, shape index: {}]   ;;  %s751_s1 = inlined_call_operand.hbm [shape: f32[128,384], index: 1, kind: input, shape index: {}]   ;;  %s752_s2 = inlined_call_operand.hbm [shape: f32[128,128], index: 2, kind: input, shape index: {}]   ;;  %s753_s3 = inlined_call_operand.vmem [shape: f32[1,128], index: 3, kind: input, shape index: {}]   ;;  %s754_s4 = inlined_call_operand.hbm [shape: f32[2,128], index: 4, kind: output, shape index: {}]  }
   0x1   :  { %10 = vsyncpa [#allocation8], 0  ;;  %s29_s17 = sshll.u32 %s751_s1, 4  ;;  %s30_s17 = int_to_ptr.hbm [resolvable:$true] %s29_s17 }
   0x2   :  { %11 = vsyncpa [#allocation6], 0  ;;  %s622_s18 = smov [#allocation7]   ;;  %s16_s22 = sshll.u32 %s750_s0, 4  ;;  %s17_s22 = int_to_ptr.hbm [resolvable:$true] %s16_s22 }
   0x3   :  { %s31_s19 = sshll.u32 %s622_s18, 4  ;;  %s623_s23 = smov 384   ;;  %s32_s19 = int_to_ptr.vmem [resolvable:$true] %s31_s19 }
   0x4   :  { %s624_s24 = smov 24   ;;  %s625_s25 = smov [#allocation4]  }
   0x5   :  { %37 = dma.hbm_to_vmem [thread:$0]  %s30_s17, 6144, %s32_s19, [#allocation8], %s623_s23, %s623_s23, %s624_s24  }
   0x6   :  { %s18_s26 = sshll.u32 %s625_s25, 4  ;;  %s626_s27 = smov 128   ;;  %s19_s26 = int_to_ptr.vmem [resolvable:$true] %s18_s26 }
   0x7   :  { %s627_s28 = smov 8   ;;  %s42_s30 = sshll.u32 %s752_s2, 4  ;;  %s43_s30 = int_to_ptr.hbm [resolvable:$true] %s42_s30 }
   0x8   :  { %24 = dma.hbm_to_vmem [thread:$0]  %s17_s22, 256, %s19_s26, [#allocation5], %s626_s27, %s626_s27, %s627_s28  }
   0x9   :  { %s628_s5 = smov [#allocation9]  }
   0xa   :  { %s44_s6 = sshll.u32 %s628_s5, 4  ;;  %s45_s6 = int_to_ptr.vmem [resolvable:$true] %s44_s6 }
   0xb   :  { %50 = dma.hbm_to_vmem [thread:$0]  %s43_s30, 2048, %s45_s6, [#allocation8], %s626_s27, %s626_s27, %s627_s28  }
   0xc   :  { %616 = dma.done.wait [#allocation5], 256  }
   0xd   :  { %617 = vsyncadd [#allocation5], 4294967040 }
   0xe   :  { %618 = dma.done.wait [#allocation8], 8192  }
   0xf   :  { %619 = vsyncadd [#allocation8], 4294959104  ;;  %v118_v0 = vld [vmem:[#allocation7 + $0x168] sm:$0xff]  ;;  %v119_v1 = vld [vmem:[#allocation7 + $0x170] sm:$0xff]  ;;  %vm307_vm8 = vcmask 1041409   ;;  %s631_s7 = smov [#allocation10]  }
  0x10   :  { %v120_v2 = vld [vmem:[#allocation7 + $0x178] sm:$0xff]  ;;  %121 = vmatpush.msra.mxu0 %v118_v0  ;;  %144 = vmatpush.msra.mxu1 %v119_v1  ;;  %v115_v3 = vld [vmem:[#allocation7 + $0x150] sm:$0xff]  ;;  %v117_v5 = vld [vmem:[#allocation7 + $0x160] sm:$0xff]  ;;  %s450_s8 = sshll.u32 %s631_s7, 4  ;;  %s452_s11 = sshll.u32 %s754_s4, 4  ;;  %s451_s8 = int_to_ptr.vmem [resolvable:$true] %s450_s8  ;;  %s453_s11 = int_to_ptr.hbm [resolvable:$true] %s452_s11 }
  0x11   :  { %v116_v4 = vld [vmem:[#allocation7 + $0x158] sm:$0xff]  ;;  %167 = vmatpush.msra.mxu2 %v120_v2  ;;  %v113_v7 = vld [vmem:[#allocation7 + $0x140] sm:$0xff]  ;;  %v114_v8 = vld [vmem:[#allocation7 + $0x148] sm:$0xff] }
  0x12   :  { %v112_v6 = vld [vmem:[#allocation7 + $0x138] sm:$0xff]  ;;  %122 = vmatpush.msra.mxu0 %v115_v3  ;;  %145 = vmatpush.msra.mxu1 %v116_v4  ;;  %v109_v9 = vld [vmem:[#allocation7 + $0x120] sm:$0xff]  ;;  %v110_v10 = vld [vmem:[#allocation7 + $0x128] sm:$0xff] }
  0x13   :  { %168 = vmatpush.msra.mxu2 %v117_v5  ;;  %v111_v11 = vld [vmem:[#allocation7 + $0x130] sm:$0xff]  ;;  %v106_v12 = vld [vmem:[#allocation7 + $0x108] sm:$0xff]  ;;  %v108_v14 = vld [vmem:[#allocation7 + $0x118] sm:$0xff] }
  0x14   :  { %123 = vmatpush.msra.mxu0 %v112_v6  ;;  %146 = vmatpush.msra.mxu1 %v113_v7  ;;  %v107_v13 = vld [vmem:[#allocation7 + $0x110] sm:$0xff]  ;;  %v104_v16 = vld [vmem:[#allocation7 + $0xf8] sm:$0xff]  ;;  %v105_v17 = vld [vmem:[#allocation7 + $0x100] sm:$0xff] }
  0x15   :  { %169 = vmatpush.msra.mxu2 %v114_v8  ;;  %v103_v15 = vld [vmem:[#allocation7 + $0xf0] sm:$0xff]  ;;  %v100_v18 = vld [vmem:[#allocation7 + $0xd8] sm:$0xff]  ;;  %v101_v19 = vld [vmem:[#allocation7 + $0xe0] sm:$0xff] }
  0x16   :  { %124 = vmatpush.msra.mxu0 %v109_v9  ;;  %147 = vmatpush.msra.mxu1 %v110_v10  ;;  %v102_v20 = vld [vmem:[#allocation7 + $0xe8] sm:$0xff]  ;;  %v97_v21 = vld [vmem:[#allocation7 + $0xc0] sm:$0xff]  ;;  %v99_v23 = vld [vmem:[#allocation7 + $0xd0] sm:$0xff] }
  0x17   :  { %170 = vmatpush.msra.mxu2 %v111_v11  ;;  %v98_v22 = vld [vmem:[#allocation7 + $0xc8] sm:$0xff]  ;;  %v95_v25 = vld [vmem:[#allocation7 + $0xb0] sm:$0xff]  ;;  %v96_v26 = vld [vmem:[#allocation7 + $0xb8] sm:$0xff] }
  0x18   :  { %125 = vmatpush.msra.mxu0 %v106_v12  ;;  %148 = vmatpush.msra.mxu1 %v107_v13  ;;  %v94_v24 = vld [vmem:[#allocation7 + $0xa8] sm:$0xff]  ;;  %v91_v27 = vld [vmem:[#allocation7 + $0x90] sm:$0xff]  ;;  %v92_v28 = vld [vmem:[#allocation7 + $0x98] sm:$0xff] }
  0x19   :  { %171 = vmatpush.msra.mxu2 %v108_v14  ;;  %v93_v29 = vld [vmem:[#allocation7 + $0xa0] sm:$0xff]  ;;  %v88_v30 = vld [vmem:[#allocation7 + $0x78] sm:$0xff]  ;;  %v90_v32 = vld [vmem:[#allocation7 + $0x88] sm:$0xff] }
  0x1a   :  { %126 = vmatpush.msra.mxu0 %v103_v15  ;;  %149 = vmatpush.msra.mxu1 %v104_v16  ;;  %v89_v31 = vld [vmem:[#allocation7 + $0x80] sm:$0xff]  ;;  %v86_v34 = vld [vmem:[#allocation7 + $0x68] sm:$0xff]  ;;  %v87_v35 = vld [vmem:[#allocation7 + $0x70] sm:$0xff] }
  0x1b   :  { %172 = vmatpush.msra.mxu2 %v105_v17  ;;  %v85_v33 = vld [vmem:[#allocation7 + $0x60] sm:$0xff]  ;;  %v82_v36 = vld [vmem:[#allocation7 + $0x48] sm:$0xff]  ;;  %v83_v37 = vld [vmem:[#allocation7 + $0x50] sm:$0xff] }
  0x1c   :  { %127 = vmatpush.msra.mxu0 %v100_v18  ;;  %150 = vmatpush.msra.mxu1 %v101_v19  ;;  %v84_v38 = vld [vmem:[#allocation7 + $0x58] sm:$0xff]  ;;  %v79_v39 = vld [vmem:[#allocation7 + $0x30] sm:$0xff]  ;;  %v81_v41 = vld [vmem:[#allocation7 + $0x40] sm:$0xff] }
  0x1d   :  { %173 = vmatpush.msra.mxu2 %v102_v20  ;;  %v80_v40 = vld [vmem:[#allocation7 + $0x38] sm:$0xff]  ;;  %v77_v43 = vld [vmem:[#allocation7 + $0x20] sm:$0xff]  ;;  %v78_v44 = vld [vmem:[#allocation7 + $0x28] sm:$0xff] }
  0x1e   :  { %128 = vmatpush.msra.mxu0 %v97_v21  ;;  %151 = vmatpush.msra.mxu1 %v98_v22  ;;  %v76_v42 = vld [vmem:[#allocation7 + $0x18] sm:$0xff]  ;;  %v73_v45 = vld [vmem:[#allocation7] sm:$0xff]  ;;  %v74_v46 = vld [vmem:[#allocation7 + $0x8] sm:$0xff] }
  0x1f   :  { %174 = vmatpush.msra.mxu2 %v99_v23  ;;  %v75_v47 = vld [vmem:[#allocation7 + $0x10] sm:$0xff]  ;;  %v72_v49 = vld [vmem:[#allocation4 + $0x8] sm:$0xff] }
  0x20   :  { %129 = vmatpush.msra.mxu0 %v94_v24  ;;  %152 = vmatpush.msra.mxu1 %v95_v25  ;;  %v71_v48 = vld [vmem:[#allocation4] sm:$0xff] }
  0x21   :  { %175 = vmatpush.msra.mxu2 %v96_v26  ;;  %v413_v26 = vld [vmem:[#allocation9 + $0x78] sm:$0xff] }
  0x22   :  { %130 = vmatpush.msra.mxu0 %v91_v27  ;;  %153 = vmatpush.msra.mxu1 %v92_v28  ;;  %v412_v27 = vld [vmem:[#allocation9 + $0x70] sm:$0xff] }
  0x23   :  { %176 = vmatpush.msra.mxu2 %v93_v29  ;;  %424 = vmatpush.msra.mxu3 %v413_v26 }
  0x24   :  { %131 = vmatpush.msra.mxu0 %v88_v30  ;;  %154 = vmatpush.msra.mxu1 %v89_v31  ;;  %v411_v31 = vld [vmem:[#allocation9 + $0x68] sm:$0xff] }
  0x25   :  { %177 = vmatpush.msra.mxu2 %v90_v32  ;;  %425 = vmatpush.msra.mxu3 %v412_v27 }
  0x26   :  { %132 = vmatpush.msra.mxu0 %v85_v33  ;;  %155 = vmatpush.msra.mxu1 %v86_v34  ;;  %v403_v33 = vld [vmem:[#allocation9 + $0x28] sm:$0xff] }
  0x27   :  { %178 = vmatpush.msra.mxu2 %v87_v35  ;;  %426 = vmatpush.msra.mxu3 %v411_v31 }
  0x28   :  { %133 = vmatpush.msra.mxu0 %v82_v36  ;;  %156 = vmatpush.msra.mxu1 %v83_v37 }
  0x29   :  { %179 = vmatpush.msra.mxu2 %v84_v38 }
  0x2a   :  { %134 = vmatpush.msra.mxu0 %v79_v39  ;;  %157 = vmatpush.msra.mxu1 %v80_v40  ;;  %v410_v40 = vld [vmem:[#allocation9 + $0x60] sm:$0xff] }
  0x2b   :  { %180 = vmatpush.msra.mxu2 %v81_v41  ;;  %427 = vmatpush.msra.mxu3 %v410_v40  ;;  %v402_v39 = vld [vmem:[#allocation9 + $0x20] sm:$0xff] }
  0x2c   :  { %135 = vmatpush.msra.mxu0 %v76_v42  ;;  %158 = vmatpush.msra.mxu1 %v77_v43 }
  0x2d   :  { %181 = vmatpush.msra.mxu2 %v78_v44 }
  0x2e   :  { %136 = vmatpush.msra.mxu0 %v73_v45  ;;  %159 = vmatpush.msra.mxu1 %v74_v46 }
  0x2f   :  { %182 = vmatpush.msra.mxu2 %v75_v47  ;;  %137 = vmatmul.f32.vlgmr.msra.gmra.mxu0 %v71_v48 }
  0x30   :  { %160 = vmatmul.f32.vlgmr.msra.gmra.mxu1 %v71_v48  ;;  %183 = vmatmul.f32.vlgmr.msra.gmra.mxu2 %v71_v48  ;;  %v409_v48 = vld [vmem:[#allocation9 + $0x58] sm:$0xff] }
  0x31   :  { %428 = vmatpush.msra.mxu3 %v409_v48 }
  0x37   :  { %140 = vmatmul.f32.gmra.mxu0 %v72_v49 }
  0x38   :  { %163 = vmatmul.f32.gmra.mxu1 %v72_v49  ;;  %186 = vmatmul.f32.gmra.mxu2 %v72_v49  ;;  %v629_v49 = vmov -0.6931472  }
  0x39   :  { %69 = vst [vmem:[#allocation2] sm:$0x3] %v629_v49 }
  0xac   :  { %v138_v50 = vpop.f32.mrf.mxu0 }
  0xad   :  { %v190_v51 = vsub.f32 0.0, %v138_v50  ;;  %v666_v52 = vpop.f32.mrf.mxu1 }
  0xae   :  { %v222_v53 = vsub.f32 0.0, %v666_v52 }
  0xaf   :  { %v194_v54 = vand.u32 2147483647, %v190_v51  ;;  %v192_v30 = vmax.f32 %v190_v51, 0.0 }
  0xb0   :  { %v226_v55 = vand.u32 2147483647, %v222_v53  ;;  %v224_v46 = vmax.f32 %v222_v53, 0.0 }
  0xb1   :  { %v196_v56 = vsub.f32 0.0, %v194_v54 }
  0xb2   :  { %v228_v57 = vsub.f32 0.0, %v226_v55 }
  0xb3   :  { %v198_v58 = vmul.f32 1.442695, %v196_v56  ;;  %v671_v59 = vpop.f32.mrf.mxu2 }
  0xb4   :  { %v230_v60 = vmul.f32 1.442695, %v228_v57  ;;  %v256_v61 = vmin.f32 %v671_v59, 0.0  ;;  %v674_v62 = vpop.f32.mrf.mxu0  ;;  %v463_v12 = vadd.f32 -0.5, %v671_v59  ;;  %vm262_vm0 = vcmp.ge.f32.partialorder %v671_v59, 0.0 }
  0xb5   :  { %476 = vpow2.f32 %v198_v58  ;;  %v191_v63 = vsub.f32 0.0, %v674_v62  ;;  %v677_v0 = vpop.f32.mrf.mxu1  ;;  %v630_v57 = vmov 1.0  }
  0xb6   :  { %478 = vpow2.f32 %v230_v60  ;;  %v258_v1 = vmul.f32 1.442695, %v256_v61  ;;  %v223_v2 = vsub.f32 0.0, %v677_v0  ;;  %70 = vst [vmem:[#allocation3] sm:$0x3] %v630_v57  ;;  %v400_v0 = vld [vmem:[#allocation9 + $0x10] sm:$0xff] }
  0xb7   :  { %v195_v3 = vand.u32 2147483647, %v191_v63  ;;  %v193_v31 = vmax.f32 %v191_v63, 0.0 }
  0xb8   :  { %480 = vpow2.f32 %v258_v1  ;;  %v227_v4 = vand.u32 2147483647, %v223_v2  ;;  %v408_v1 = vld [vmem:[#allocation9 + $0x50] sm:$0xff] }
  0xb9   :  { %v197_v5 = vsub.f32 0.0, %v195_v3  ;;  %429 = vmatpush.msra.mxu3 %v408_v1 }
  0xba   :  { %v229_v6 = vsub.f32 0.0, %v227_v4 }
  0xbb   :  { %v477_v7 = vpop.eup %476  ;;  %v200_v8 = vmul.f32 1.442695, %v197_v5  ;;  %v684_v9 = vpop.f32.mrf.mxu2  ;;  %v407_v5 = vld [vmem:[#allocation9 + $0x48] sm:$0xff] }
  0xbc   :  { %v479_v10 = vpop.eup %478  ;;  %v202_v11 = vadd.f32 1.0, %v477_v7  ;;  %v205_v13 = vmul.f32 -0.5, %v477_v7  ;;  %v232_v15 = vmul.f32 1.442695, %v229_v6  ;;  %v257_v18 = vmin.f32 %v684_v9, 0.0  ;;  %430 = vmatpush.msra.mxu3 %v407_v5 }
  0xbd   :  { %v234_v14 = vadd.f32 1.0, %v479_v10  ;;  %482 = vpow2.f32 %v200_v8  ;;  %v237_v17 = vmul.f32 -0.5, %v479_v10  ;;  %v208_v20 = vand.u32 2147483647, %v477_v7 }
  0xbe   :  { %v481_v16 = vpop.eup %480  ;;  %484 = vlog2.f32 %v202_v11  ;;  %v240_v21 = vand.u32 2147483647, %v479_v10  ;;  %v206_v24 = vadd.f32 1.0, %v205_v13  ;;  %v260_v25 = vmul.f32 1.442695, %v257_v18 }
  0xbf   :  { %486 = vlog2.f32 %v234_v14  ;;  %v266_v19 = vsel %vm262_vm0, %v463_v12, %v481_v16  ;;  %v238_v28 = vadd.f32 1.0, %v237_v17  ;;  %vm693_vm1 = vcmp.lt.f32.partialorder %v208_v20, 0.0004427343  ;;  %v405_v20 = vld [vmem:[#allocation9 + $0x38] sm:$0xff] }
  0xc0   :  { %v268_v22 = vadd.f32 1.0, %v266_v19  ;;  %v271_v23 = vmul.f32 -0.5, %v266_v19  ;;  %488 = vpow2.f32 %v232_v15  ;;  %v207_v38 = vmul.f32 %v477_v7, %v206_v24  ;;  %v406_v15 = vld [vmem:[#allocation9 + $0x40] sm:$0xff] }
  0xc1   :  { %vm698_vm2 = vcmp.lt.f32.partialorder %v240_v21, 0.0004427343  ;;  %v239_v42 = vmul.f32 %v479_v10, %v238_v28  ;;  %v274_v43 = vand.u32 2147483647, %v266_v19  ;;  %vm263_vm3 = vcmp.ge.f32.partialorder %v684_v9, 0.0  ;;  %431 = vmatpush.msra.mxu3 %v406_v15 }
  0xc2   :  { %490 = vlog2.f32 %v268_v22  ;;  %v272_v34 = vadd.f32 1.0, %v271_v23  ;;  %v464_v47 = vadd.f32 -0.5, %v684_v9 }
  0xc3   :  { %v691_v29 = vpop.eup %482  ;;  %492 = vpow2.f32 %v260_v25  ;;  %vm275_vm4 = vcmp.lt.f32.partialorder %v274_v43, 0.0004427343  ;;  %432 = vmatpush.msra.mxu3 %v405_v20 }
  0xc4   :  { %v485_v32 = vpop.eup %484  ;;  %v211_v35 = vadd.f32 1.0, %v691_v29  ;;  %v273_v54 = vmul.f32 %v272_v34, %v266_v19  ;;  %v214_v55 = vmul.f32 -0.5, %v691_v29  ;;  %v217_v12 = vand.u32 2147483647, %v691_v29 }
  0xc5   :  { %v487_v36 = vpop.eup %486  ;;  %v204_v37 = vmul.f32 0.6931472, %v485_v32 }
  0xc6   :  { %v236_v41 = vmul.f32 0.6931472, %v487_v36  ;;  %494 = vlog2.f32 %v211_v35  ;;  %v489_v44 = vpop.eup %488  ;;  %v215_v8 = vadd.f32 1.0, %v214_v55  ;;  %vm721_vm5 = vcmp.lt.f32.partialorder %v217_v12, 0.0004427343 }
  0xc7   :  { %v210_v45 = vsel %vm693_vm1, %v207_v38, %v204_v37  ;;  %v243_v56 = vadd.f32 1.0, %v489_v44  ;;  %v246_v61 = vmul.f32 -0.5, %v489_v44  ;;  %v249_v18 = vand.u32 2147483647, %v489_v44 }
  0xc8   :  { %v491_v50 = vpop.eup %490  ;;  %v242_v51 = vsel %vm698_vm2, %v239_v42, %v236_v41  ;;  %v220_v53 = vadd.f32 %v210_v45, %v192_v30  ;;  %v216_v22 = vmul.f32 %v691_v29, %v215_v8  ;;  %v225_v29 = vmax.f32 %v223_v2, 0.0  ;;  %v401_v41 = vld [vmem:[#allocation9 + $0x18] sm:$0xff] }
  0xc9   :  { %v493_v52 = vpop.eup %492  ;;  %v252_v58 = vadd.f32 %v242_v51, %v224_v46  ;;  %v270_v60 = vmul.f32 0.6931472, %v491_v50  ;;  %496 = vlog2.f32 %v243_v56  ;;  %v247_v13 = vadd.f32 1.0, %v246_v61  ;;  %v292_v56 = vld [vmem:[#allocation2] sm:$0x3] }
  0xca   :  { %v267_v3 = vsel %vm263_vm3, %v464_v47, %v493_v52  ;;  %vm250_vm6 = vcmp.lt.f32.partialorder %v249_v18, 0.0004427343  ;;  %v398_v47 = vld [vmem:[#allocation9] sm:$0xff] }
  0xcb   :  { %v276_v4 = vsel %vm275_vm4, %v273_v54, %v270_v60  ;;  %v277_v10 = vadd.f32 1.0, %v267_v3  ;;  %v714_v11 = vsub.f32 %v220_v53, %v252_v58  ;;  %v280_v14 = vmul.f32 -0.5, %v267_v3 }
  0xcc   :  { %v495_v6 = vpop.eup %494  ;;  %v286_v7 = vsub.f32 %v671_v59, %v276_v4  ;;  %v248_v25 = vmul.f32 %v489_v44, %v247_v13  ;;  %v404_v59 = vld [vmem:[#allocation9 + $0x30] sm:$0xff]  ;;  %v283_v28 = vand.u32 2147483647, %v267_v3  ;;  %v399_v44 = vld [vmem:[#allocation9 + $0x8] sm:$0xff] }
  0xcd   :  { %v213_v17 = vmul.f32 0.6931472, %v495_v6  ;;  %498 = vlog2.f32 %v277_v10  ;;  %v281_v26 = vadd.f32 1.0, %v280_v14  ;;  %433 = vmatpush.msra.mxu3 %v404_v59 }
  0xce   :  { %v288_v16 = vsel %vm262_vm0, %v276_v4, %v286_v7  ;;  %vm284_vm7 = vcmp.lt.f32.partialorder %v283_v28, 0.0004427343 }
  0xcf   :  { %v290_v19 = vadd.f32 %v288_v16, %v714_v11  ;;  %v497_v21 = vpop.eup %496  ;;  %v219_v27 = vsel %vm721_vm5, %v216_v22, %v213_v17  ;;  %v282_v38 = vmul.f32 %v281_v26, %v267_v3  ;;  %434 = vmatpush.msra.mxu3 %v403_v33  ;;  %v352_v3 = vand.u32 2147483647, %v714_v11 }
  0xd0   :  { %v245_v24 = vmul.f32 0.6931472, %v497_v21  ;;  %v221_v35 = vadd.f32 %v219_v27, %v193_v31 }
  0xd1   :  { %v293_v30 = vrot.slane %v290_v19, 4  ;;  %435 = vmatpush.msra.mxu3 %v402_v39  ;;  %v354_v8 = vsub.f32 0.0, %v352_v3 }
  0xd2   :  { %v251_v32 = vsel %vm250_vm6, %v248_v25, %v245_v24 }
  0xd3   :  { %v499_v34 = vpop.eup %498  ;;  %v253_v36 = vadd.f32 %v251_v32, %v225_v29  ;;  %v294_v42 = vmax.f32 %v290_v19, %v293_v30  ;;  %436 = vmatpush.msra.mxu3 %v401_v41  ;;  %v356_v13 = vmul.f32 1.442695, %v354_v8  ;;  %v323_v30 = vld [vmem:[#allocation3] sm:$0x3] }
  0xd4   :  { %v279_v37 = vmul.f32 0.6931472, %v499_v34 }
  0xd5   :  { %v732_v63 = vsub.f32 %v221_v35, %v253_v36  ;;  %v295_v45 = vrot.slane %v294_v42, 2  ;;  %437 = vmatpush.msra.mxu3 %v400_v0 }
  0xd6   :  { %v285_v40 = vsel %vm284_vm7, %v282_v38, %v279_v37 }
  0xd7   :  { %v287_v62 = vsub.f32 %v684_v9, %v285_v40  ;;  %438 = vmatpush.msra.mxu3 %v399_v44  ;;  %v296_v49 = vmax.f32 %v294_v42, %v295_v45  ;;  %v353_v4 = vand.u32 2147483647, %v732_v63 }
  0xd9   :  { %v289_v2 = vsel %vm263_vm3, %v285_v40, %v287_v62  ;;  %439 = vmatpush.msra.mxu3 %v398_v47  ;;  %v297_v51 = vrot.slane %v296_v49, 1  ;;  %v355_v10 = vsub.f32 0.0, %v353_v4 }
  0xda   :  { %v291_v43 = vadd.f32 %v289_v2, %v732_v63 }
  0xdb   :  { %v298_v9 = vmax.f32 %v296_v49, %v297_v51  ;;  %v358_v15 = vmul.f32 1.442695, %v355_v10  ;;  %v351_v51 = vmax.f32 %v732_v63, 0.0  ;;  %v475_v10 = vld [vmem:[%s753_s3] ss:$0 sm:$0xff] }
  0xdc   :  { %v299_v46 = vrot.slane %v291_v43, 4 }
  0xde   :  { %v300_v48 = vmax.f32 %v291_v43, %v299_v46 }
  0xe0   :  { %v301_v50 = vrot.slane %v300_v48, 2 }
  0xe2   :  { %v302_v54 = vmax.f32 %v300_v48, %v301_v50  ;;  %v350_v50 = vmax.f32 %v714_v11, 0.0 }
  0xe4   :  { %v303_v55 = vrot.slane %v302_v54, 1 }
  0xe6   :  { %v304_v57 = vmax.f32 %v302_v54, %v303_v55 }
  0xe8   :  { %v308_v52 = vsel %vm307_vm8, %v304_v57, %v298_v9 }
  0xe9   :  { %v310_v53 = vmax.f32 %v292_v56, %v308_v52 }
  0xeb   :  { %v312_v58 = vrot.slane %v310_v53, 1  ;;  %v313_v60 = vperm.slane %v310_v53, 0  ;;  %346 = vst [vmem:[#allocation2] sm:$0x3] %v310_v53  ;;  %v324_v12 = vsub.f32 %v292_v56, %v310_v53 }
  0xed   :  { %v314_v61 = vperm.slane %v312_v58, 0  ;;  %v317_v1 = vsub.f32 %v290_v19, %v313_v60  ;;  %v325_v16 = vmul.f32 1.442695, %v324_v12 }
  0xef   :  { %v318_v5 = vsub.f32 %v291_v43, %v314_v61  ;;  %v319_v6 = vmul.f32 1.442695, %v317_v1 }
  0xf1   :  { %500 = vpow2.f32 %v319_v6  ;;  %v321_v7 = vmul.f32 1.442695, %v318_v5 }
  0xf2   :  { %v382_v57 = vld [vmem:[#allocation2] sm:$0x3] }
  0xf3   :  { %502 = vpow2.f32 %v321_v7 }
  0xf4   :  { %504 = vpow2.f32 %v356_v13 }
  0xf5   :  { %506 = vpow2.f32 %v358_v15 }
  0xf6   :  { %508 = vpow2.f32 %v325_v16 }
  0xf7   :  { %v501_v14 = vpop.eup %500 }
  0xf8   :  { %v328_v17 = vrot.slane %v501_v14, 4 }
  0xf9   :  { %v503_v18 = vpop.eup %502 }
  0xfa   :  { %v329_v19 = vadd.f32 %v501_v14, %v328_v17  ;;  %v334_v20 = vrot.slane %v503_v18, 4  ;;  %v505_v25 = vpop.eup %504 }
  0xfb   :  { %v507_v27 = vpop.eup %506  ;;  %v360_v29 = vadd.f32 1.0, %v505_v25  ;;  %v363_v38 = vmul.f32 -0.5, %v505_v25  ;;  %v366_v0 = vand.u32 2147483647, %v505_v25 }
  0xfc   :  { %v330_v21 = vrot.slane %v329_v19, 2  ;;  %v335_v22 = vadd.f32 %v503_v18, %v334_v20  ;;  %v509_v28 = vpop.eup %508  ;;  %v369_v34 = vadd.f32 1.0, %v507_v27  ;;  %v372_v39 = vmul.f32 -0.5, %v507_v27 }
  0xfd   :  { %v327_v35 = vmul.f32 %v509_v28, %v323_v30  ;;  %510 = vlog2.f32 %v360_v29  ;;  %v364_v42 = vadd.f32 1.0, %v363_v38  ;;  %v375_v2 = vand.u32 2147483647, %v507_v27 }
  0xfe   :  { %v331_v23 = vadd.f32 %v330_v21, %v329_v19  ;;  %v336_v24 = vrot.slane %v335_v22, 2  ;;  %512 = vlog2.f32 %v369_v34  ;;  %v373_v62 = vadd.f32 1.0, %v372_v39 }
  0xff   :  { %v365_v46 = vmul.f32 %v505_v25, %v364_v42  ;;  %vm367_vm9 = vcmp.lt.f32.partialorder %v366_v0, 0.0004427343  ;;  %vm376_vm10 = vcmp.lt.f32.partialorder %v375_v2, 0.0004427343 }
 0x100   :  { %v332_v26 = vrot.slane %v331_v23, 1  ;;  %v337_v59 = vadd.f32 %v336_v24, %v335_v22  ;;  %v374_v47 = vmul.f32 %v507_v27, %v373_v62 }
 0x102   :  { %v338_v31 = vrot.slane %v337_v59, 1  ;;  %v333_v32 = vadd.f32 %v332_v26, %v331_v23 }
 0x103   :  { %v511_v40 = vpop.eup %510 }
 0x104   :  { %v339_v33 = vadd.f32 %v338_v31, %v337_v59  ;;  %v513_v41 = vpop.eup %512  ;;  %v362_v44 = vmul.f32 0.6931472, %v511_v40 }
 0x105   :  { %v371_v45 = vmul.f32 0.6931472, %v513_v41 }
 0x106   :  { %v342_v36 = vsel %vm307_vm8, %v339_v33, %v333_v32  ;;  %v368_v48 = vsel %vm367_vm9, %v365_v46, %v362_v44 }
 0x107   :  { %v344_v37 = vadd.f32 %v342_v36, %v327_v35  ;;  %v377_v49 = vsel %vm376_vm10, %v374_v47, %v371_v45  ;;  %v378_v55 = vadd.f32 %v368_v48, %v350_v50 }
 0x108   :  { %v379_v56 = vadd.f32 %v377_v49, %v351_v51 }
 0x109   :  { %345 = vst [vmem:[#allocation3] sm:$0x3] %v344_v37  ;;  %v380_v53 = vsub.f32 0.0, %v378_v55 }
 0x10a   :  { %v381_v58 = vsub.f32 0.0, %v379_v56 }
 0x110   :  { %v383_v43 = vld [vmem:[#allocation3] sm:$0x3] }
 0x111   :  { %514 = vlog2.f32 %v383_v43 }
 0x117   :  { %v515_v54 = vpop.eup %514 }
 0x118   :  { %v385_v9 = vmul.f32 0.6931472, %v515_v54 }
 0x11a   :  { %v386_v52 = vadd.f32 %v385_v9, %v382_v57 }
 0x11c   :  { %v388_v60 = vrot.slane %v386_v52, 1  ;;  %v389_v61 = vrot.slane %v386_v52, 2 }
 0x11e   :  { %v392_v1 = vadd.f32 %v388_v60, %v380_v53  ;;  %v393_v3 = vadd.f32 %v389_v61, %v381_v58 }
 0x120   :  { %v394_v4 = vmul.f32 1.442695, %v392_v1  ;;  %v396_v5 = vmul.f32 1.442695, %v393_v3 }
 0x122   :  { %516 = vpow2.f32 %v394_v4 }
 0x123   :  { %518 = vpow2.f32 %v396_v5 }
 0x128   :  { %v517_v6 = vpop.eup %516 }
 0x129   :  { %v519_v11 = vpop.eup %518  ;;  %v420_v7 = vrot.slane %v517_v6, 7 }
 0x12a   :  { %v421_v63 = vrot.slane %v519_v11, 6 }
 0x12c   :  { %v422_v8 = vsel %vm307_vm8, %v421_v63, %v420_v7 }
 0x12d   :  { %440 = vmatmul.f32.vlgmr.msra.gmra.mxu3 %v422_v8 }
 0x1b0   :  { %v441_v12 = vpop.f32.mrf.mxu3 }
 0x1b1   :  { %v442_v13 = vadd.f32 %v475_v10, %v441_v12 }
 0x1b3   :  { %444 = vst [vmem:[#allocation10] sm:$0x3] %v442_v13 }
 0x1b4   :  { %455 = dma.vmem_to_hbm [thread:$0]  %s451_s8, 32, %s453_s11, [#allocation6]  }
 0x1b5   :  { %620 = dma.done.wait [#allocation6], 32  }
 0x1b6   :  { %621 = vsyncadd [#allocation6], 4294967264 }
 0x1b7   :  { %460 = vsyncpa [#allocation5], 1 }
 0x1b8   :  { %461 = vsyncpa [#allocation8], 1 }
 0x1b9   :  { %462 = vsyncpa [#allocation6], 1 }

</bundles_post_ra>
